<compile_context>
chip_gen: v7x
topology: tpu7x:2x2x1
jax: 0.10.0
libtpu: 0.0.40
codegen_flags: <defaults>
</compile_context>

<pallas_src>
import math
from functools import partial

import jax
import jax.numpy as jnp
from jax.experimental import pallas as pl
from jax.experimental.pallas import tpu as pltpu

LN_EPS = 1e-5


def _layernorm(x, gamma, beta):
    # PyTorch nn.LayerNorm semantics: biased variance over the last dim, eps inside sqrt.
    mean = jnp.mean(x, axis=-1, keepdims=True)
    var = jnp.mean((x - mean) ** 2, axis=-1, keepdims=True)
    return (x - mean) * jax.lax.rsqrt(var + LN_EPS) * gamma + beta


# ----------------------------------------------------------------------------- kernel


def fused_encoder_kernel(col_emb_ref, x_num_ref, tok_emb_ref,
                         gamma_ref, beta_ref, num_bias_ref, w_t_ref,
                         out_ref, *, matmul_dtype):
    """Fused TransTabFeatureProcessor forward for one batch tile.

    col_emb:  (n_num, H)      pooled (LN + masked-mean) numerical column-name embeddings
                              (batch-invariant, grid-constant)
    x_num:    (TB, n_num, 1)  numerical values for this batch tile
    tok_emb:  (TB, S_tok, H)  word embeddings of cat+bin tokens (bf16 when matmul bf16)
    gamma/beta/num_bias: (1, H)
    w_t:      (H, H)          align_layer weight, already transposed + cast (y = x @ w_t)
    out:      (TB, n_num + S_tok, H)
    """
    TB, S_tok, H = tok_emb_ref.shape
    n_num = col_emb_ref.shape[0]

    gamma = gamma_ref[...][None]                                   # (1, 1, H)
    beta = beta_ref[...][None]
    w = w_t_ref[...]                                               # (H, H), matmul_dtype

    # ---- categorical + binary token path: LN in f32, MXU matmul in matmul_dtype -----
    t = tok_emb_ref[...].astype(jnp.float32)                       # (TB, S_tok, H)
    ln_t = _layernorm(t, gamma, beta)
    y_tok = jnp.dot(ln_t.astype(matmul_dtype).reshape(TB * S_tok, H), w,
                    preferred_element_type=jnp.float32)            # (TB*S_tok, H)
    out_ref[:, n_num:, :] = y_tok.reshape(TB, S_tok, H).astype(out_ref.dtype)

    # ---- numerical path: col_emb * x_num + bias, then the same matmul ----------------
    x_num = x_num_ref[...].astype(jnp.float32)                     # (TB, n_num, 1)
    pre_num = (col_emb_ref[...][None] * x_num
               + num_bias_ref[...][None])                          # (TB, n_num, H)
    y_num = jnp.dot(pre_num.astype(matmul_dtype).reshape(TB * n_num, H), w,
                    preferred_element_type=jnp.float32)            # (TB*n_num, H)
    out_ref[:, :n_num, :] = y_num.reshape(TB, n_num, H).astype(out_ref.dtype)


# ----------------------------------------------------------------------------- wrapper


def _pick_batch_tile(B, total_S, per_row_vmem_bytes, vmem_budget_bytes=20 * 2 ** 20):
    """Largest batch tile (a divisor of B) that:
      * targets ~4096 matmul rows (>= ~2 MB HBM traffic) per grid step,
      * stays under a conservative per-step VMEM budget (safe vs v7x 32 MiB scoped
        default with double-buffered input/output tiles),
      * leaves >= 2 grid steps when B > 8 so the "parallel" batch axis can shard
        across both v7x TensorCores.
    """
    if B <= 8:
        return B
    vmem_cap = max(1, vmem_budget_bytes // max(per_row_vmem_bytes, 1))
    want = max(8, -(-4096 // total_S))          # ~4096 rows per step
    want = min(want, vmem_cap, B // 2)          # >= 2 grid steps
    divisors = set()
    i = 1
    while i * i <= B:
        if B % i == 0:
            divisors.add(i)
            divisors.add(B // i)
        i += 1
    candidates = [d for d in divisors if d <= max(want, 1)]
    mult8 = [d for d in candidates if d % 8 == 0]
    return max(mult8) if mult8 else max(candidates)


def transtab_input_encoder_forward(params, tokenized, batch_tile=None,
                                   matmul_dtype=jnp.bfloat16,
                                   out_dtype=jnp.float32):
    """Equivalent of TransTabInputEncoder.forward on already-tokenized features.

    # TODO(synk): the feature_extractor itself (pandas DataFrame -> HF tokenizer ids)
    # is host-side string processing with no Pallas equivalent; we start from its output.
    """
    word_emb = params["word_emb"].astype(jnp.float32)    # (vocab, H)
    gamma, beta = params["ln_gamma"], params["ln_beta"]  # (1, H)
    num_bias = params["num_bias"]                        # (1, H)
    # pre-transpose + pre-cast once: kernel contracts over the RHS leading dim.
    w_t = params["w_align"].T.astype(matmul_dtype)       # (H, H)

    x_num = tokenized["x_num"]                           # (B, n_num)
    num_col_ids = tokenized["num_col_input_ids"]         # (n_num, T)
    num_att_mask = tokenized["num_att_mask"]             # (n_num, T)
    cat_ids = tokenized["x_cat_input_ids"]               # (B, S_cat)
    cat_att_mask = tokenized["cat_att_mask"]             # (B, S_cat)
    bin_ids = tokenized["x_bin_input_ids"]               # (B, S_bin)

    B, n_num = x_num.shape
    S_cat, S_bin = cat_ids.shape[1], bin_ids.shape[1]
    S_tok = S_cat + S_bin
    total_S = n_num + S_tok
    H = word_emb.shape[1]

    # ---- batch-invariant numerical-column pooling (hoisted out of the grid loop) -----
    col_tok_emb = jnp.take(word_emb, num_col_ids, axis=0)             # (n_num, T, H) f32
    ln_cols = _layernorm(col_tok_emb, gamma, beta)
    m = num_att_mask.astype(jnp.float32)
    # clamp avoids NaN if a column name has no valid token (PyTorch would produce NaN)
    denom = jnp.maximum(m.sum(1, keepdims=True), 1.0)
    col_emb = (ln_cols * m[:, :, None]).sum(1) / denom                # (n_num, H) f32

    # ---- cat+bin token embeddings: single gather, in bf16 when matmul is bf16 --------
    tok_dtype = (jnp.bfloat16 if jnp.dtype(matmul_dtype) == jnp.dtype(jnp.bfloat16)
                 else jnp.float32)
    tok_ids = jnp.concatenate([cat_ids, bin_ids], axis=1)             # (B, S_tok)
    tok_emb = jnp.take(word_emb.astype(tok_dtype), tok_ids, axis=0)   # (B, S_tok, H)

    x_num3 = x_num[:, :, None].astype(jnp.float32)                    # (B, n_num, 1)

    # per-batch-row VMEM: double-buffered in/out tiles + in-kernel f32 temporaries
    tok_bytes = jnp.dtype(tok_dtype).itemsize
    out_bytes = jnp.dtype(out_dtype).itemsize
    per_row = (2 * (S_tok * H * tok_bytes + total_S * H * out_bytes + n_num * 4)
               + 4 * total_S * H * 4)
    if batch_tile is None:
        batch_tile = _pick_batch_tile(B, total_S, per_row)
    assert B % batch_tile == 0
    nb = B // batch_tile

    embedding = pl.pallas_call(
        partial(fused_encoder_kernel, matmul_dtype=matmul_dtype),
        out_shape=jax.ShapeDtypeStruct((B, total_S, H), out_dtype),
        grid=(nb,),
        in_specs=[
            pl.BlockSpec((n_num, H), lambda b: (0, 0)),               # col_emb (const)
            pl.BlockSpec((batch_tile, n_num, 1), lambda b: (b, 0, 0)),  # x_num
            pl.BlockSpec((batch_tile, S_tok, H), lambda b: (b, 0, 0)),  # tok_emb
            pl.BlockSpec((1, H), lambda b: (0, 0)),                   # gamma  (const)
            pl.BlockSpec((1, H), lambda b: (0, 0)),                   # beta   (const)
            pl.BlockSpec((1, H), lambda b: (0, 0)),                   # num_bias (const)
            pl.BlockSpec((H, H), lambda b: (0, 0)),                   # w_t    (const)
        ],
        out_specs=pl.BlockSpec((batch_tile, total_S, H), lambda b: (b, 0, 0)),
        compiler_params=pltpu.CompilerParams(dimension_semantics=("parallel",)),
    )(col_emb, x_num3, tok_emb, gamma, beta, num_bias, w_t)

    attention_mask = jnp.concatenate(
        [jnp.ones((B, n_num), jnp.float32),
         cat_att_mask.astype(jnp.float32),
         jnp.ones((B, S_bin), jnp.float32)], axis=1)
    return {"embedding": embedding, "attention_mask": attention_mask}


# ----------------------------------------------------------------------------- reference


def reference_forward(params, tokenized):
    word_emb = params["word_emb"]
    gamma, beta = params["ln_gamma"], params["ln_beta"]
    num_bias, w = params["num_bias"], params["w_align"]

    def ln(x):
        return _layernorm(x, gamma[0], beta[0])

    num_col_emb = jnp.take(word_emb, tokenized["num_col_input_ids"], axis=0)
    num_col_emb = ln(num_col_emb)
    m = tokenized["num_att_mask"].astype(jnp.float32)
    num_col_emb = (num_col_emb * m[:, :, None]).sum(1) / m.sum(1, keepdims=True)
    num_feat = num_col_emb[None] * tokenized["x_num"][:, :, None] + num_bias[None]
    num_feat = num_feat @ w.T

    cat_feat = ln(jnp.take(word_emb, tokenized["x_cat_input_ids"], axis=0)) @ w.T
    bin_feat = ln(jnp.take(word_emb, tokenized["x_bin_input_ids"], axis=0)) @ w.T
    return jnp.concatenate([num_feat, cat_feat, bin_feat], axis=1)


# ----------------------------------------------------------------------------- main

if __name__ == "__main__":
    B, H = 2, 128
    vocab = 100
    n_num, T = 3, 4          # numerical columns, tokens per column name
    S_cat, S_bin = 6, 2      # categorical / binary token sequence lengths

    key = jax.random.PRNGKey(0)
    k = jax.random.split(key, 10)

    params = {
        # nn.Embedding(vocab, H) with kaiming_normal_ init
        "word_emb": jax.random.normal(k[0], (vocab, H), jnp.float32) * math.sqrt(2.0 / H),
        "ln_gamma": jnp.ones((1, H), jnp.float32),
        "ln_beta": jnp.zeros((1, H), jnp.float32),
        # TransTabNumEmbedding.num_bias ~ U(-1/sqrt(H), 1/sqrt(H))
        "num_bias": jax.random.uniform(k[1], (1, H), jnp.float32,
                                       -1.0 / math.sqrt(H), 1.0 / math.sqrt(H)),
        # align_layer = nn.Linear(H, H, bias=False)
        "w_align": jax.random.uniform(k[2], (H, H), jnp.float32,
                                      -1.0 / math.sqrt(H), 1.0 / math.sqrt(H)),
    }

    tokenized = {
        "x_num": jax.random.normal(k[3], (B, n_num), jnp.float32),
        "num_col_input_ids": jax.random.randint(k[4], (n_num, T), 1, vocab, jnp.int32),
        "num_att_mask": (jax.random.uniform(k[5], (n_num, T)) > 0.3).astype(jnp.float32),
        "x_cat_input_ids": jax.random.randint(k[6], (B, S_cat), 1, vocab, jnp.int32),
        "cat_att_mask": (jax.random.uniform(k[7], (B, S_cat)) > 0.3).astype(jnp.float32),
        "x_bin_input_ids": jax.random.randint(k[8], (B, S_bin), 1, vocab, jnp.int32),
    }
    # make sure no column-name mask row is all-zero (would be NaN in PyTorch)
    tokenized["num_att_mask"] = tokenized["num_att_mask"].at[:, 0].set(1.0)

    ref = reference_forward(params, tokenized)

    # default path: bf16 MXU inputs + bf16 token gather (f32 accumulate, f32 LayerNorm)
    out = transtab_input_encoder_forward(params, tokenized)
    jax.block_until_ready(out)
    assert out["embedding"].shape == (B, n_num + S_cat + S_bin, H)
    assert out["attention_mask"].shape == (B, n_num + S_cat + S_bin)
    assert jnp.allclose(out["embedding"], ref, atol=2.5e-2, rtol=2.5e-2)

    # full-f32 path exactly matches PyTorch numerics
    out_f32 = transtab_input_encoder_forward(params, tokenized,
                                             matmul_dtype=jnp.float32)
    jax.block_until_ready(out_f32)
    assert jnp.allclose(out_f32["embedding"], ref, atol=1e-4, rtol=1e-4)

    print("KERNEL_OK")
</pallas_src>

<mosaic_0001>
module attributes {stable_mosaic.version = 11 : i64} {
  func.func @fused_encoder_kernel(%arg0: i32, %arg1: memref<3x128xf32, #tpu.memory_space<vmem>>, %arg2: memref<2x3x1xf32, #tpu.memory_space<vmem>>, %arg3: memref<2x8x128xbf16, #tpu.memory_space<vmem>>, %arg4: memref<1x128xf32, #tpu.memory_space<vmem>>, %arg5: memref<1x128xf32, #tpu.memory_space<vmem>>, %arg6: memref<1x128xf32, #tpu.memory_space<vmem>>, %arg7: memref<128x128xbf16, #tpu.memory_space<vmem>>, %arg8: memref<2x11x128xf32, #tpu.memory_space<vmem>>) attributes {dimension_semantics = [#tpu.dimension_semantics<parallel>], iteration_bounds = array<i64: 1>, scalar_prefetch = 0 : i64, scratch_operands = 0 : i64, tpu.core_type = #tpu.core_type<tc>, window_params = [{pipeline_mode = #tpu.pipeline_mode<synchronous>, transform_indices = @transform_0, window_bounds = array<i64: 3, 128>}, {transform_indices = @transform_1, window_bounds = array<i64: 2, 3, 1>}, {transform_indices = @transform_2, window_bounds = array<i64: 2, 8, 128>}, {pipeline_mode = #tpu.pipeline_mode<synchronous>, transform_indices = @transform_3, window_bounds = array<i64: 1, 128>}, {pipeline_mode = #tpu.pipeline_mode<synchronous>, transform_indices = @transform_4, window_bounds = array<i64: 1, 128>}, {pipeline_mode = #tpu.pipeline_mode<synchronous>, transform_indices = @transform_5, window_bounds = array<i64: 1, 128>}, {pipeline_mode = #tpu.pipeline_mode<synchronous>, transform_indices = @transform_6, window_bounds = array<i64: 128, 128>}, {transform_indices = @transform_7, window_bounds = array<i64: 2, 11, 128>}]} {
    %c0 = arith.constant 0 : index
    %c0_0 = arith.constant 0 : index
    %0 = vector.load %arg4[%c0, %c0_0] : memref<1x128xf32, #tpu.memory_space<vmem>>, vector<1x128xf32>
    %1 = vector.shape_cast %0 : vector<1x128xf32> to vector<1x1x128xf32>
    %c0_1 = arith.constant 0 : index
    %c0_2 = arith.constant 0 : index
    %2 = vector.load %arg5[%c0_1, %c0_2] : memref<1x128xf32, #tpu.memory_space<vmem>>, vector<1x128xf32>
    %3 = vector.shape_cast %2 : vector<1x128xf32> to vector<1x1x128xf32>
    %c0_3 = arith.constant 0 : index
    %c0_4 = arith.constant 0 : index
    %4 = vector.load %arg7[%c0_3, %c0_4] : memref<128x128xbf16, #tpu.memory_space<vmem>>, vector<128x128xbf16>
    %c0_5 = arith.constant 0 : index
    %c0_6 = arith.constant 0 : index
    %c0_7 = arith.constant 0 : index
    %5 = vector.load %arg3[%c0_5, %c0_6, %c0_7] : memref<2x8x128xbf16, #tpu.memory_space<vmem>>, vector<2x8x128xbf16>
    %6 = arith.extf %5 : vector<2x8x128xbf16> to vector<2x8x128xf32>
    %cst = arith.constant dense<0.000000e+00> : vector<2x8xf32>
    %7 = vector.multi_reduction <add>, %6, %cst [2] : vector<2x8x128xf32> to vector<2x8xf32>
    %8 = vector.shape_cast %7 : vector<2x8xf32> to vector<2x8x1xf32>
    %cst_8 = arith.constant 1.280000e+02 : f32
    %9 = vector.broadcast %cst_8 : f32 to vector<2x8x1xf32>
    %10 = arith.divf %8, %9 : vector<2x8x1xf32>
    %11 = vector.broadcast %10 : vector<2x8x1xf32> to vector<2x8x128xf32>
    %12 = arith.subf %6, %11 : vector<2x8x128xf32>
    %13 = arith.mulf %12, %12 : vector<2x8x128xf32>
    %cst_9 = arith.constant dense<0.000000e+00> : vector<2x8xf32>
    %14 = vector.multi_reduction <add>, %13, %cst_9 [2] : vector<2x8x128xf32> to vector<2x8xf32>
    %15 = vector.shape_cast %14 : vector<2x8xf32> to vector<2x8x1xf32>
    %cst_10 = arith.constant 1.280000e+02 : f32
    %16 = vector.broadcast %cst_10 : f32 to vector<2x8x1xf32>
    %17 = arith.divf %15, %16 : vector<2x8x1xf32>
    %18 = vector.broadcast %10 : vector<2x8x1xf32> to vector<2x8x128xf32>
    %19 = arith.subf %6, %18 : vector<2x8x128xf32>
    %cst_11 = arith.constant 9.99999974E-6 : f32
    %20 = vector.broadcast %cst_11 : f32 to vector<2x8x1xf32>
    %21 = arith.addf %17, %20 : vector<2x8x1xf32>
    %22 = math.rsqrt %21 : vector<2x8x1xf32>
    %23 = vector.broadcast %22 : vector<2x8x1xf32> to vector<2x8x128xf32>
    %24 = arith.mulf %19, %23 : vector<2x8x128xf32>
    %25 = vector.broadcast %1 : vector<1x1x128xf32> to vector<2x8x128xf32>
    %26 = arith.mulf %24, %25 : vector<2x8x128xf32>
    %27 = vector.broadcast %3 : vector<1x1x128xf32> to vector<2x8x128xf32>
    %28 = arith.addf %26, %27 : vector<2x8x128xf32>
    %29 = arith.truncf %28 : vector<2x8x128xf32> to vector<2x8x128xbf16>
    %30 = vector.shape_cast %29 : vector<2x8x128xbf16> to vector<16x128xbf16>
    %cst_12 = arith.constant dense<0.000000e+00> : vector<16x128xf32>
    %31 = tpu.matmul %30, %4, %cst_12 {dimension_numbers = #tpu.dot_dimension_numbers<[1], [0], [0], [1], [0, 0, 1, 1], [], []>} : vector<16x128xbf16>, vector<128x128xbf16>, vector<16x128xf32> -> vector<16x128xf32>
    %32 = vector.shape_cast %31 : vector<16x128xf32> to vector<2x8x128xf32>
    %c0_13 = arith.constant 0 : index
    %c3 = arith.constant 3 : index
    %c0_14 = arith.constant 0 : index
    %33 = vector.load %arg8[%c0_13, %c3, %c0_14] : memref<2x11x128xf32, #tpu.memory_space<vmem>>, vector<2x8x128xf32>
    tpu.vector_store %arg8[%c0_13, %c3, %c0_14], %32 {strides = array<i32>} : memref<2x11x128xf32, #tpu.memory_space<vmem>>, vector<2x8x128xf32>,
    %c0_15 = arith.constant 0 : index
    %c0_16 = arith.constant 0 : index
    %c0_17 = arith.constant 0 : index
    %34 = vector.load %arg2[%c0_15, %c0_16, %c0_17] : memref<2x3x1xf32, #tpu.memory_space<vmem>>, vector<2x3x1xf32>
    %c0_18 = arith.constant 0 : index
    %c0_19 = arith.constant 0 : index
    %35 = vector.load %arg1[%c0_18, %c0_19] : memref<3x128xf32, #tpu.memory_space<vmem>>, vector<3x128xf32>
    %36 = vector.shape_cast %35 : vector<3x128xf32> to vector<1x3x128xf32>
    %37 = vector.broadcast %36 : vector<1x3x128xf32> to vector<2x3x128xf32>
    %38 = vector.broadcast %34 : vector<2x3x1xf32> to vector<2x3x128xf32>
    %39 = arith.mulf %37, %38 : vector<2x3x128xf32>
    %c0_20 = arith.constant 0 : index
    %c0_21 = arith.constant 0 : index
    %40 = vector.load %arg6[%c0_20, %c0_21] : memref<1x128xf32, #tpu.memory_space<vmem>>, vector<1x128xf32>
    %41 = vector.shape_cast %40 : vector<1x128xf32> to vector<1x1x128xf32>
    %42 = vector.broadcast %41 : vector<1x1x128xf32> to vector<2x3x128xf32>
    %43 = arith.addf %39, %42 : vector<2x3x128xf32>
    %44 = arith.truncf %43 : vector<2x3x128xf32> to vector<2x3x128xbf16>
    %45 = vector.shape_cast %44 : vector<2x3x128xbf16> to vector<6x128xbf16>
    %cst_22 = arith.constant dense<0.000000e+00> : vector<6x128xf32>
    %46 = tpu.matmul %45, %4, %cst_22 {dimension_numbers = #tpu.dot_dimension_numbers<[1], [0], [0], [1], [0, 0, 1, 1], [], []>} : vector<6x128xbf16>, vector<128x128xbf16>, vector<6x128xf32> -> vector<6x128xf32>
    %47 = vector.shape_cast %46 : vector<6x128xf32> to vector<2x3x128xf32>
    %c0_23 = arith.constant 0 : index
    %c0_24 = arith.constant 0 : index
    %c0_25 = arith.constant 0 : index
    %48 = vector.load %arg8[%c0_23, %c0_24, %c0_25] : memref<2x11x128xf32, #tpu.memory_space<vmem>>, vector<2x3x128xf32>
    tpu.vector_store %arg8[%c0_23, %c0_24, %c0_25], %47 {strides = array<i32>} : memref<2x11x128xf32, #tpu.memory_space<vmem>>, vector<2x3x128xf32>,
    return
  }
  func.func @transform_0(%arg0: i32) -> (i32, i32) {
    %c0_i32 = arith.constant 0 : i32
    %c0_i32_0 = arith.constant 0 : i32
    %c0_i32_1 = arith.constant 0 : i32
    return %c0_i32, %c0_i32_0 : i32, i32
  }
  func.func @transform_1(%arg0: i32) -> (i32, i32, i32) {
    %c0_i32 = arith.constant 0 : i32
    %c0_i32_0 = arith.constant 0 : i32
    %c0_i32_1 = arith.constant 0 : i32
    return %arg0, %c0_i32, %c0_i32_0 : i32, i32, i32
  }
  func.func @transform_2(%arg0: i32) -> (i32, i32, i32) {
    %c0_i32 = arith.constant 0 : i32
    %c0_i32_0 = arith.constant 0 : i32
    %c0_i32_1 = arith.constant 0 : i32
    return %arg0, %c0_i32, %c0_i32_0 : i32, i32, i32
  }
  func.func @transform_3(%arg0: i32) -> (i32, i32) {
    %c0_i32 = arith.constant 0 : i32
    %c0_i32_0 = arith.constant 0 : i32
    %c0_i32_1 = arith.constant 0 : i32
    return %c0_i32, %c0_i32_0 : i32, i32
  }
  func.func @transform_4(%arg0: i32) -> (i32, i32) {
    %c0_i32 = arith.constant 0 : i32
    %c0_i32_0 = arith.constant 0 : i32
    %c0_i32_1 = arith.constant 0 : i32
    return %c0_i32, %c0_i32_0 : i32, i32
  }
  func.func @transform_5(%arg0: i32) -> (i32, i32) {
    %c0_i32 = arith.constant 0 : i32
    %c0_i32_0 = arith.constant 0 : i32
    %c0_i32_1 = arith.constant 0 : i32
    return %c0_i32, %c0_i32_0 : i32, i32
  }
  func.func @transform_6(%arg0: i32) -> (i32, i32) {
    %c0_i32 = arith.constant 0 : i32
    %c0_i32_0 = arith.constant 0 : i32
    %c0_i32_1 = arith.constant 0 : i32
    return %c0_i32, %c0_i32_0 : i32, i32
  }
  func.func @transform_7(%arg0: i32) -> (i32, i32, i32) {
    %c0_i32 = arith.constant 0 : i32
    %c0_i32_0 = arith.constant 0 : i32
    %c0_i32_1 = arith.constant 0 : i32
    return %arg0, %c0_i32, %c0_i32_0 : i32, i32, i32
  }
}

</mosaic_0001>

<bundles_post_ra>
// kernel: tpu_custom_call.1
= control target key start
LH: loop header
LB: loop body
LE: loop exit
PB: predicated region body
PF: predicated region fallthrough
CT: control target
= control target key end

     0   :  { %12 = vsyncpa [#allocation3], 0  ;;  %s573_s24 = smov [#allocation2]   ;;  %s698_s0 = inlined_call_operand.vmem [shape: f32[3,128], index: 0, kind: input, shape index: {}]   ;;  %s699_s1 = inlined_call_operand.vmem [shape: f32[2,3,1], index: 1, kind: input, shape index: {}]   ;;  %s700_s2 = inlined_call_operand.vmem [shape: bf16[2,8,128], index: 2, kind: input, shape index: {}]   ;;  %s701_s3 = inlined_call_operand.vmem [shape: f32[1,128], index: 3, kind: input, shape index: {}]   ;;  %s702_s4 = inlined_call_operand.vmem [shape: f32[1,128], index: 4, kind: input, shape index: {}]   ;;  %s703_s5 = inlined_call_operand.vmem [shape: f32[1,128], index: 5, kind: input, shape index: {}]   ;;  %s704_s6 = inlined_call_operand.hbm [shape: bf16[128,128], index: 6, kind: input, shape index: {}]   ;;  %s705_s7 = inlined_call_operand.vmem [shape: f32[2,11,128], index: 7, kind: output, shape index: {}]  }
   0x1   :  { %s30_s25 = sshll.u32 %s573_s24, 4  ;;  %s549_s28 = scalar_lea.hbm %s704_s6, 1024  ;;  %s31_s25 = int_to_ptr.vmem [resolvable:$true] %s30_s25 }
   0x2   :  { %p550_p0 = scmp.ne.s32.totalorder %s704_s6, %s549_s28  ;;  %p553_p1 = scmp.lt.u32.totalorder %s549_s28, %s704_s6 }
   0x4   :  { %p555_p2 = pnand %p553_p1, %p550_p0 }
   0x6   :  { %558 = shalt.err (!%p555_p2)
}
   0x7   :  { %s559_s10 = scalar_lea.vmem %s31_s25, 1024  ;;  %p564_p4 = scmp.lt.s32.totalorder %s31_s25, %s31_s25 }
   0x8   :  { %p560_p3 = scmp.ne.s32.totalorder %s31_s25, %s559_s10  ;;  %p565_p5 = scmp.lt.s32.totalorder %s559_s10, %s559_s10 }
   0xa   :  { %p566_p6 = por %p565_p5, %p564_p4 }
   0xc   :  { %p567_p7 = pnand %p566_p6, %p560_p3 }
   0xe   :  { %570 = shalt.err (!%p567_p7)
}
   0xf   :  { %s574_s11 = smov 64   ;;  %s575_s12 = smov 4  }
  0x10   :  { %36 = dma.hbm_to_vmem [thread:$0]  %s704_s6, 1024, %s31_s25, [#allocation3], %s574_s11, %s574_s11, %s575_s12  }
  0x11   :  { %571 = dma.done.wait [#allocation3], 1024  }
  0x12   :  { %572 = vsyncadd [#allocation3], 4294966272  ;;  %v576_v0 = vmov 0   ;;  %v635_v1 = vld [vmem:[%s700_s2] sm:$0xff]   ;;  %v577_v7 = vmov 0.0   ;;  %vm578_vm0 = vmmov 0   ;;  %v232_v17 = vlaneseq }
  0x13   :  { %535 = vset.pattern.permute.xlu1 %v576_v0  ;;  %536 = vset.pattern.permute.xlu0 %v576_v0  ;;  %v201_v2 = vld [vmem:[%s699_s1] sm:$0x7]  ;;  %v202_v3 = vld [vmem:[%s699_s1 + $0x4] sm:$0x7]  ;;  %v468_v4 = vunpack.c.l.bf16 %v635_v1  ;;  %v469_v5 = vunpack.c.h.bf16 %v635_v1  ;;  %v538_v8 = vld [vmem:[#allocation2 + $0x8] sm:$0xff]  }
  0x14   :  { %206 = vperm.xlu1 %535, %v201_v2   ;;  %v537_v6 = vld [vmem:[#allocation2] sm:$0xff]   ;;  %508 = vmatprep.subr.bf16.mxu1 %v577_v7  ;;  %v539_v9 = vld [vmem:[#allocation2 + $0x10] sm:$0xff]   ;;  %v540_v10 = vld [vmem:[#allocation2 + $0x18] sm:$0xff]   ;;  %v579_v15 = vmov 1966171168   ;;  %v233_v20 = vshrl.u32 %v232_v17, 7 }
  0x15   :  { %63 = vadd.xlane.f32.xlu0 %v468_v4  ;;  %524 = vmatprep.mubr.msk.bf16.mxu1 %vm578_vm0, %v577_v7  ;;  %v541_v11 = vld [vmem:[#allocation2 + $0x20] sm:$0xff]   ;;  %v542_v12 = vld [vmem:[#allocation2 + $0x28] sm:$0xff]   ;;  %v543_v13 = vld [vmem:[#allocation2 + $0x30] sm:$0xff]   ;;  %v230_v16 = vunpack.c.l.s4 %v579_v15 }
  0x16   :  { %509 = vmatpush3.bf16.msra.mxu1 %v537_v6  ;;  %488 = vmatprep.subr.bf16.mxu0 %v577_v7  ;;  %v544_v14 = vld [vmem:[#allocation2 + $0x38] sm:$0xff]   ;;  %v203_v18 = vld [vmem:[%s698_s0] sm:$0x7] }
  0x17   :  { %510 = vmatprep.subr.bf16.mxu1 %v577_v7  ;;  %489 = vmatpush3.bf16.msra.mxu0 %v537_v6  ;;  %v231_v19 = vunpack.c.0.s8 %v230_v16  ;;  %v460_v21 = vld [vmem:[%s703_s5] ss:$0 sm:$0xff] }
  0x18   :  { %211 = vperm.xlu1 %535, %v202_v3   ;;  %490 = vmatprep.subr.bf16.mxu0 %v577_v7  ;;  %v449_v63 = vld [vmem:[%s701_s3] ss:$0 sm:$0xff] }
  0x19   :  { %65 = vadd.xlane.f32.xlu0 %v469_v5  ;;  %504 = vmatprep.mubr.msk.bf16.mxu0 %vm578_vm0, %v577_v7  ;;  %v655_v24 = vsub.s32 %v231_v19, %v233_v20  ;;  %v450_v3 = vld [vmem:[%s702_s4] ss:$0 sm:$0xff] }
  0x1a   :  { %511 = vmatpush3.bf16.msra.mxu1 %v538_v8 }
  0x1b   :  { %512 = vmatprep.subr.bf16.mxu1 %v577_v7  ;;  %491 = vmatpush3.bf16.msra.mxu0 %v538_v8 }
  0x1c   :  { %492 = vmatprep.subr.bf16.mxu0 %v577_v7 }
  0x1e   :  { %513 = vmatpush3.bf16.msra.mxu1 %v539_v9 }
  0x1f   :  { %514 = vmatprep.subr.bf16.mxu1 %v577_v7  ;;  %493 = vmatpush3.bf16.msra.mxu0 %v539_v9 }
  0x20   :  { %494 = vmatprep.subr.bf16.mxu0 %v577_v7 }
  0x22   :  { %515 = vmatpush3.bf16.msra.mxu1 %v540_v10 }
  0x23   :  { %516 = vmatprep.subr.bf16.mxu1 %v577_v7  ;;  %495 = vmatpush3.bf16.msra.mxu0 %v540_v10 }
  0x24   :  { %496 = vmatprep.subr.bf16.mxu0 %v577_v7 }
  0x26   :  { %517 = vmatpush3.bf16.msra.mxu1 %v541_v11 }
  0x27   :  { %518 = vmatprep.subr.bf16.mxu1 %v577_v7  ;;  %497 = vmatpush3.bf16.msra.mxu0 %v541_v11 }
  0x28   :  { %498 = vmatprep.subr.bf16.mxu0 %v577_v7 }
  0x2a   :  { %519 = vmatpush3.bf16.msra.mxu1 %v542_v12 }
  0x2b   :  { %520 = vmatprep.subr.bf16.mxu1 %v577_v7  ;;  %499 = vmatpush3.bf16.msra.mxu0 %v542_v12 }
  0x2c   :  { %500 = vmatprep.subr.bf16.mxu0 %v577_v7 }
  0x2e   :  { %521 = vmatpush3.bf16.msra.mxu1 %v543_v13 }
  0x2f   :  { %522 = vmatprep.subr.bf16.mxu1 %v577_v7  ;;  %501 = vmatpush3.bf16.msra.mxu0 %v543_v13 }
  0x30   :  { %502 = vmatprep.subr.bf16.mxu0 %v577_v7 }
  0x32   :  { %523 = vmatpush3.bf16.msra.mxu1 %v544_v14 }
  0x33   :  { %503 = vmatpush3.bf16.msra.mxu0 %v544_v14 }
  0x93   :  { %v207_v22 = vpop.permute.xlu1 %206 }
  0x94   :  { %v214_v23 = vmul.f32 %v207_v22, %v203_v18 }
  0x96   :  { %v223_v25 = vadd.f32 %v460_v21, %v214_v23 }
  0x97   :  { %v212_v26 = vpop.permute.xlu1 %211 }
  0x98   :  { %v225_v27 = vpack.c.bf16 %v223_v25, %v223_v25  ;;  %v215_v28 = vmul.f32 %v212_v26, %v203_v18 }
  0x9a   :  { %v235_v29 = vrot.slane %v225_v27, %v655_v24  ;;  %v224_v30 = vadd.f32 %v460_v21, %v215_v28 }
  0x9c   :  { %v236_v31 = vcombine.high %v235_v29, %v235_v29  ;;  %v226_v32 = vpack.c.bf16 %v224_v30, %v224_v30  ;;  %v243_v35 = vrot.slane %v235_v29, %v655_v24 }
  0x9e   :  { %v250_v33 = vrot.slane %v236_v31, %v655_v24  ;;  %v257_v34 = vrot.slane %v226_v32, %v655_v24 }
  0xa0   :  { %v258_v36 = vcombine.high %v257_v34, %v257_v34  ;;  %v265_v37 = vrot.slane %v257_v34, %v655_v24 }
  0xa2   :  { %v272_v38 = vrot.slane %v258_v36, %v655_v24  ;;  %v277_v39 = vunpack.i.h.s16 %v265_v37  ;;  %v461_v40 = vpack.i.b16 %v265_v37, %v250_v33  ;;  %v64_v41 = vpop.xlane.xlu0 %63 }
  0xa3   :  { %v68_v42 = vmul.f32 0.0078125, %v64_v41 }
  0xa4   :  { %v462_v43 = vpack.i.b16 %v272_v38, %v277_v39  ;;  %v282_v44 = vcombine.low %v243_v35, %v461_v40 }
  0xa5   :  { %v70_v45 = vsub.f32 %v468_v4, %v68_v42 }
  0xa6   :  { %v289_v46 = vrot.slane %v282_v44, %v655_v24  ;;  %v296_v47 = vrot.slane %v462_v43, %v655_v24  ;;  %v66_v48 = vpop.xlane.xlu0 %65 }
  0xa7   :  { %v69_v49 = vmul.f32 0.0078125, %v66_v48  ;;  %v72_v50 = vmul.f32 %v70_v45, %v70_v45 }
  0xa8   :  { %v297_v51 = vcombine.low %v289_v46, %v296_v47 }
  0xa9   :  { %v71_v52 = vsub.f32 %v469_v5, %v69_v49  ;;  %74 = vadd.xlane.f32.xlu0 %v72_v50 }
  0xaa   :  { %v304_v53 = vrot.slane %v297_v51, %v655_v24 }
  0xab   :  { %v73_v54 = vmul.f32 %v71_v52, %v71_v52 }
  0xac   :  { %525 = vmatmul.mubr.bf16.vlgmr.msra.gmra.mrb[0].mxu1 %v304_v53 }
  0xad   :  { %76 = vadd.xlane.f32.xlu1 %v73_v54 }
 0x136   :  { %v75_v55 = vpop.xlane.xlu0 %74 }
 0x137   :  { %v78_v56 = vmul.f32 0.0078125, %v75_v55 }
 0x139   :  { %v80_v57 = vadd.f32 1e-05, %v78_v56 }
 0x13a   :  { %v77_v58 = vpop.xlane.xlu1 %76 }
 0x13b   :  { %545 = vrsqrt.f32 %v80_v57  ;;  %v79_v59 = vmul.f32 0.0078125, %v77_v58 }
 0x13d   :  { %v81_v60 = vadd.f32 1e-05, %v79_v59 }
 0x13f   :  { %547 = vrsqrt.f32 %v81_v60 }
 0x145   :  { %v546_v61 = vpop.eup %545 }
 0x146   :  { %v84_v62 = vmul.f32 %v546_v61, %v70_v45 }
 0x148   :  { %v92_v2 = vmul.f32 %v449_v63, %v84_v62 }
 0x149   :  { %v548_v0 = vpop.eup %547 }
 0x14a   :  { %v85_v1 = vmul.f32 %v548_v0, %v71_v52  ;;  %v100_v5 = vadd.f32 %v450_v3, %v92_v2 }
 0x14c   :  { %v93_v4 = vmul.f32 %v449_v63, %v85_v1 }
 0x14e   :  { %v101_v6 = vadd.f32 %v450_v3, %v93_v4 }
 0x150   :  { %v465_v7 = vpack.c.bf16 %v101_v6, %v100_v5 }
 0x152   :  { %505 = vmatmul.mubr.bf16.vlgmr.msra.gmra.mrb[0].mxu0 %v465_v7 }
 0x17f   :  { %v340_v8 = vpop.f32.mrb[0].mxu1 }
 0x180   :  { %v347_v9 = vcombine.high %v340_v8, %v340_v8  ;;  %v354_v10 = vrot.slane %v340_v8, %v655_v24  ;;  %v526_v11 = vpop.f32.mrb[1].mxu1 }
 0x181   :  { %v343_v12 = vpop.f32.mrb[2].mxu1 }
 0x182   :  { %v361_v13 = vrot.slane %v347_v9, %v655_v24  ;;  %v362_v14 = vcombine.high %v354_v10, %v354_v10  ;;  %v370_v15 = vrot.slane %v354_v10, %v655_v24  ;;  %v527_v16 = vpop.f32.mrb[3].mxu1 }
 0x184   :  { %v363_v17 = vcombine.high %v361_v13, %v361_v13  ;;  %v377_v18 = vrot.slane %v361_v13, %v655_v24  ;;  %v384_v19 = vrot.slane %v362_v14, %v655_v24  ;;  %v392_v20 = vcombine.high %v370_v15, %v370_v15 }
 0x186   :  { %v391_v21 = vrot.slane %v363_v17, %v655_v24  ;;  %v393_v22 = vcombine.high %v384_v19, %v384_v19  ;;  %v394_v23 = vcombine.low %v370_v15, %v384_v19  ;;  %v408_v25 = vrot.slane %v392_v20, %v655_v24 }
 0x188   :  { %v401_v26 = vrot.slane %v394_v23, %v655_v24  ;;  %v417_v27 = vcombine.low %v393_v22, %v377_v18  ;;  %v431_v28 = vrot.slane %v391_v21, %v655_v24 }
 0x18a   :  { %v409_v29 = vcombine.low %v401_v26, %v408_v25  ;;  %v424_v30 = vrot.slane %v417_v27, %v655_v24 }
 0x18c   :  { %v432_v31 = vcombine.low %v424_v30, %v431_v28  ;;  %463 = vst.sshfl [vmem:[%s705_s7] sm:$0x15 pattern:$0x73625140] %v409_v29 }
 0x18e   :  { %464 = vst.sshfl [vmem:[%s705_s7 + $0x10] sm:$0x15 pattern:$0x73625140] %v432_v31 }
 0x225   :  { %v192_v32 = vpop.f32.mrb[0].mxu0 }
 0x226   :  { %199 = vst [vmem:[%s705_s7 + $0x3] sm:$0xff] %v192_v32  ;;  %v506_v33 = vpop.f32.mrb[1].mxu0 }
 0x227   :  { %v195_v34 = vpop.f32.mrb[2].mxu0 }
 0x228   :  { %200 = vst [vmem:[%s705_s7 + $0x13] sm:$0xff] %v195_v34  ;;  %v507_v24 = vpop.f32.mrb[3].mxu0 }
 0x229   :  { %448 = vsyncpa [#allocation3], 1 }

</bundles_post_ra>
